<compile_context>
chip_gen: v6e
topology: v6e:2x2x1
jax: 0.10.0
libtpu: 0.0.40
codegen_flags: <defaults>
</compile_context>

<pallas_src>
import functools

import jax
import jax.numpy as jnp
from jax import lax
from jax.experimental import pallas as pl
from jax.experimental.pallas import tpu as pltpu

EXPANSION = 4
EPS = 1e-5


def _round_up(x, m):
    return ((x + m - 1) // m) * m


def _pick_block_batch(n):
    """Largest B_blk in {8,4,2} dividing n that keeps >= 2 grid steps."""
    for cand in (8, 4, 2):
        if n % cand == 0 and n // cand >= 2:
            return cand
    return 1


def _bottleneck_kernel(x_ref, w1_ref, w2_ref, w3_ref, b_ref, m_ref, out_ref,
                       *, H, W):
    # x_ref : (B, Cin, HW)      f32  activations, spatial flattened on lanes
    # w1_ref: (P_pad, Cin)      bf16 conv1 weight (BN1 scale folded)
    # w2_ref: (P_pad, 9*P_pad)  bf16 conv2 im2col weight (BN2 scale folded)
    # w3_ref: (Cout, P_pad)     bf16 conv3 weight (BN3 scale folded)
    # b_ref : (TOT, 1)          f32  packed BN biases (8-aligned offsets)
    # m_ref : (9, HW)           f32  precomputed 0/1 border masks per 3x3 tap
    # out_ref:(B, Cout, HW)     f32
    B = x_ref.shape[0]
    HW = x_ref.shape[2]
    P_pad = w1_ref.shape[0]
    Cout = w3_ref.shape[0]

    b1 = b_ref[0:P_pad]                          # (P_pad, 1)
    b2 = b_ref[P_pad:2 * P_pad]                  # (P_pad, 1)
    b3 = b_ref[2 * P_pad:2 * P_pad + Cout]       # (Cout, 1)

    w1 = w1_ref[...]                             # bf16 weights, loaded once
    w2 = w2_ref[...]
    w3 = w3_ref[...]

    for b in range(B):                           # unrolled, B is small (<= 8)
        x = x_ref[b]                             # (Cin, HW) f32, lane-dense

        # ---- conv1 (1x1) + bn1 + relu : bf16 MXU operands, f32 accumulate ---
        h1 = jnp.dot(w1, x.astype(jnp.bfloat16),
                     preferred_element_type=jnp.float32)
        h1 = jnp.maximum(h1 + b1, 0.0)           # (P_pad, HW) f32

        # ---- conv2 (3x3, pad=1) as a single im2col matmul (K = 9*P_pad) -----
        taps = []
        for t in range(9):
            dh, dw = t // 3 - 1, t % 3 - 1
            s = dh * W + dw                      # flat spatial shift
            tap = pltpu.roll(h1, (-s) % HW, axis=1) if s else h1
            if s:                                # center tap needs no mask
                tap = tap * m_ref[t:t + 1, :]    # zero-pad border (precomputed)
            taps.append(tap)
        # 8-aligned sublane offsets (P_pad % 8 == 0) -> concat is a plain copy.
        pat = jnp.concatenate(taps, axis=0).astype(jnp.bfloat16)  # (9*P_pad,HW)

        h2 = jnp.dot(w2, pat, preferred_element_type=jnp.float32)
        h2 = jnp.maximum(h2 + b2, 0.0)           # (P_pad, HW) f32

        # ---- conv3 (1x1) + bn3 + residual add + relu (residual stays f32) ---
        h3 = jnp.dot(w3, h2.astype(jnp.bfloat16),
                     preferred_element_type=jnp.float32)
        out_ref[b] = jnp.maximum(h3 + b3 + x, 0.0)


def bottleneck_forward(x_nchw, params, *, block_batch=None):
    """x_nchw: (N, Cin, H, W) float32. params: dict from make_params."""
    N, Cin, H, W = x_nchw.shape
    P = params["w1"].shape[1]
    Cout = params["w3"].shape[1]
    assert Cout == Cin, "stride=1 / downsample=None requires inplanes == planes*4"
    HW = H * W
    P_pad = _round_up(P, 8)

    B_blk = _pick_block_batch(N) if block_batch is None else block_batch
    assert N % B_blk == 0

    # ---- host-side weight prep (tiny, one-time) ----------------------------
    s1, s2, s3 = params["s1"][0], params["s2"][0], params["s3"][0]
    b1, b2, b3 = params["b1"][0], params["b2"][0], params["b3"][0]

    # conv1: (Cin, P) -> (P_pad, Cin), BN scale folded, zero-padded rows.
    w1t = jnp.zeros((P_pad, Cin), jnp.float32).at[:P].set((params["w1"] * s1).T)
    # conv2: (9, P_in, P_out) -> (P_pad, 9*P_pad) im2col layout, scale folded.
    w2t = jnp.transpose(params["w2"], (2, 0, 1)) * s2[:, None, None]   # (P,9,P)
    w2m = (jnp.zeros((P_pad, 9, P_pad), jnp.float32)
           .at[:P, :, :P].set(w2t)).reshape(P_pad, 9 * P_pad)
    # conv3: (P, Cout) -> (Cout, P_pad), scale folded, zero-padded columns.
    w3t = jnp.zeros((Cout, P_pad), jnp.float32).at[:, :P].set((params["w3"] * s3).T)
    # bf16 weights: ~2x MXU throughput + half the weight DMA bytes.
    w1t, w2m, w3t = (w.astype(jnp.bfloat16) for w in (w1t, w2m, w3t))
    # TODO(synk): optionally also store activations in HBM as bf16 to halve
    # activation DMA (residual then carries bf16 rounding).

    # Packed biases at 8-aligned sublane offsets (single DMA).
    tot = 2 * P_pad + _round_up(Cout, 8)
    bias = jnp.zeros((tot, 1), jnp.float32)
    bias = bias.at[:P, 0].set(b1)
    bias = bias.at[P_pad:P_pad + P, 0].set(b2)
    bias = bias.at[2 * P_pad:2 * P_pad + Cout, 0].set(b3)

    # Precomputed 0/1 border masks, one row per 3x3 tap.
    pos = jnp.arange(HW)
    hh, ww = pos // W, pos % W
    rows = []
    for t in range(9):
        dh, dw = t // 3 - 1, t % 3 - 1
        valid = ((hh + dh >= 0) & (hh + dh < H) & (ww + dw >= 0) & (ww + dw < W))
        rows.append(valid.astype(jnp.float32))
    masks = jnp.stack(rows)                      # (9, HW)

    x3 = x_nchw.reshape(N, Cin, HW)              # free reshape, stays NCHW

    kernel = functools.partial(_bottleneck_kernel, H=H, W=W)

    flops = 2 * N * HW * (P_pad * Cin + 9 * P_pad * P_pad + Cout * P_pad)
    bytes_accessed = (x3.size * 4 + N * Cout * HW * 4
                      + (w1t.size + w2m.size + w3t.size) * 2
                      + bias.size * 4 + masks.size * 4)

    out3 = pl.pallas_call(
        kernel,
        out_shape=jax.ShapeDtypeStruct((N, Cout, HW), jnp.float32),
        grid_spec=pltpu.PrefetchScalarGridSpec(
            num_scalar_prefetch=0,
            grid=(N // B_blk,),
            in_specs=[
                pl.BlockSpec((B_blk, Cin, HW), lambda n: (n, 0, 0)),   # x
                pl.BlockSpec((P_pad, Cin), lambda n: (0, 0)),          # w1
                pl.BlockSpec((P_pad, 9 * P_pad), lambda n: (0, 0)),    # w2
                pl.BlockSpec((Cout, P_pad), lambda n: (0, 0)),         # w3
                pl.BlockSpec((tot, 1), lambda n: (0, 0)),              # biases
                pl.BlockSpec((9, HW), lambda n: (0, 0)),               # masks
            ],
            out_specs=pl.BlockSpec((B_blk, Cout, HW), lambda n: (n, 0, 0)),
        ),
        compiler_params=pltpu.CompilerParams(
            dimension_semantics=("parallel",),
            # Explicit VMEM budget: < 64 MiB physical on v7x, > 16 MiB v5e
            # default scoped limit, 25% headroom for double-buffered blocks.
            vmem_limit_bytes=48 * 1024 * 1024),
        cost_estimate=pl.CostEstimate(
            flops=int(flops), transcendentals=0,
            bytes_accessed=int(bytes_accessed)),
    )(x3, w1t, w2m, w3t, bias, masks)

    return out3.reshape(N, Cout, H, W)           # free reshape back to NCHW


# --------------------------- reference (pure JAX) ---------------------------
def bottleneck_reference(x_nchw, params):
    x = jnp.transpose(x_nchw, (0, 2, 3, 1))
    Cin, P = params["w1"].shape
    Cout = params["w3"].shape[1]
    dn = ("NHWC", "HWIO", "NHWC")

    h = lax.conv_general_dilated(x, params["w1"].reshape(1, 1, Cin, P),
                                 (1, 1), "VALID", dimension_numbers=dn)
    h = jnp.maximum(h * params["s1"][0] + params["b1"][0], 0.0)

    h = lax.conv_general_dilated(h, params["w2"].reshape(3, 3, P, P),
                                 (1, 1), ((1, 1), (1, 1)), dimension_numbers=dn)
    h = jnp.maximum(h * params["s2"][0] + params["b2"][0], 0.0)

    h = lax.conv_general_dilated(h, params["w3"].reshape(1, 1, P, Cout),
                                 (1, 1), "VALID", dimension_numbers=dn)
    h = h * params["s3"][0] + params["b3"][0]
    out = jnp.maximum(h + x, 0.0)
    return jnp.transpose(out, (0, 3, 1, 2))


def make_params(key, inplanes, planes):
    cout = planes * EXPANSION
    ks = jax.random.split(key, 12)

    def fold_bn(gamma, beta, mean, var):
        scale = gamma / jnp.sqrt(var + EPS)
        bias = beta - mean * scale
        return scale[None, :], bias[None, :]

    w1 = 0.1 * jax.random.normal(ks[0], (inplanes, planes), jnp.float32)
    w2 = 0.1 * jax.random.normal(ks[1], (9, planes, planes), jnp.float32)
    w3 = 0.1 * jax.random.normal(ks[2], (planes, cout), jnp.float32)

    s1, b1 = fold_bn(1.0 + 0.1 * jax.random.normal(ks[3], (planes,)),
                     0.1 * jax.random.normal(ks[4], (planes,)),
                     0.05 * jax.random.normal(ks[5], (planes,)),
                     jnp.abs(1.0 + 0.1 * jax.random.normal(ks[6], (planes,))))
    s2, b2 = fold_bn(1.0 + 0.1 * jax.random.normal(ks[7], (planes,)),
                     0.1 * jax.random.normal(ks[8], (planes,)),
                     0.05 * jax.random.normal(ks[9], (planes,)),
                     jnp.abs(1.0 + 0.1 * jax.random.normal(ks[10], (planes,))))
    s3, b3 = fold_bn(jnp.ones((cout,)), jnp.zeros((cout,)),
                     jnp.zeros((cout,)), jnp.ones((cout,)))

    return {"w1": w1, "s1": s1, "b1": b1,
            "w2": w2, "s2": s2, "b2": b2,
            "w3": w3, "s3": s3, "b3": b3}


if __name__ == "__main__":
    key = jax.random.PRNGKey(0)
    k_x, k_p = jax.random.split(key)

    N, planes, H, W = 4, 4, 16, 16
    inplanes = planes * EXPANSION            # 16, so the residual add is valid
    x = jax.random.normal(k_x, (N, inplanes, H, W), jnp.float32)
    params = make_params(k_p, inplanes, planes)

    out = jax.block_until_ready(bottleneck_forward(x, params))
    ref = jax.block_until_ready(bottleneck_reference(x, params))

    assert out.shape == (N, inplanes, H, W)
    err = jnp.max(jnp.abs(out - ref))
    # bf16 matmul operands vs. f32 reference -> loosened tolerance.
    assert jnp.allclose(out, ref, atol=2e-2, rtol=2e-2), f"max abs diff {err}"
    print("KERNEL_OK")
</pallas_src>

<mosaic_0001>
module attributes {stable_mosaic.version = 11 : i64} {
  func.func @_bottleneck_kernel(%arg0: i32, %arg1: memref<2x16x256xf32, #tpu.memory_space<vmem>>, %arg2: memref<8x16xbf16, #tpu.memory_space<vmem>>, %arg3: memref<8x72xbf16, #tpu.memory_space<vmem>>, %arg4: memref<16x8xbf16, #tpu.memory_space<vmem>>, %arg5: memref<32x1xf32, #tpu.memory_space<vmem>>, %arg6: memref<9x256xf32, #tpu.memory_space<vmem>>, %arg7: memref<2x16x256xf32, #tpu.memory_space<vmem>>) attributes {dimension_semantics = [#tpu.dimension_semantics<parallel>], iteration_bounds = array<i64: 2>, scalar_prefetch = 0 : i64, scratch_operands = 0 : i64, tpu.core_type = #tpu.core_type<tc>, window_params = [{transform_indices = @transform_0, window_bounds = array<i64: 2, 16, 256>}, {pipeline_mode = #tpu.pipeline_mode<synchronous>, transform_indices = @transform_1, window_bounds = array<i64: 8, 16>}, {pipeline_mode = #tpu.pipeline_mode<synchronous>, transform_indices = @transform_2, window_bounds = array<i64: 8, 72>}, {pipeline_mode = #tpu.pipeline_mode<synchronous>, transform_indices = @transform_3, window_bounds = array<i64: 16, 8>}, {pipeline_mode = #tpu.pipeline_mode<synchronous>, transform_indices = @transform_4, window_bounds = array<i64: 32, 1>}, {pipeline_mode = #tpu.pipeline_mode<synchronous>, transform_indices = @transform_5, window_bounds = array<i64: 9, 256>}, {transform_indices = @transform_6, window_bounds = array<i64: 2, 16, 256>}]} {
    %c0 = arith.constant 0 : index
    %c0_0 = arith.constant 0 : index
    %0 = vector.load %arg5[%c0, %c0_0] : memref<32x1xf32, #tpu.memory_space<vmem>>, vector<8x1xf32>
    %c8 = arith.constant 8 : index
    %c0_1 = arith.constant 0 : index
    %1 = vector.load %arg5[%c8, %c0_1] : memref<32x1xf32, #tpu.memory_space<vmem>>, vector<8x1xf32>
    %c16 = arith.constant 16 : index
    %c0_2 = arith.constant 0 : index
    %2 = vector.load %arg5[%c16, %c0_2] : memref<32x1xf32, #tpu.memory_space<vmem>>, vector<16x1xf32>
    %c0_3 = arith.constant 0 : index
    %c0_4 = arith.constant 0 : index
    %3 = vector.load %arg2[%c0_3, %c0_4] : memref<8x16xbf16, #tpu.memory_space<vmem>>, vector<8x16xbf16>
    %c0_5 = arith.constant 0 : index
    %c0_6 = arith.constant 0 : index
    %4 = vector.load %arg3[%c0_5, %c0_6] : memref<8x72xbf16, #tpu.memory_space<vmem>>, vector<8x72xbf16>
    %c0_7 = arith.constant 0 : index
    %c0_8 = arith.constant 0 : index
    %5 = vector.load %arg4[%c0_7, %c0_8] : memref<16x8xbf16, #tpu.memory_space<vmem>>, vector<16x8xbf16>
    %c0_9 = arith.constant 0 : index
    %c0_10 = arith.constant 0 : index
    %c0_11 = arith.constant 0 : index
    %6 = vector.load %arg1[%c0_9, %c0_10, %c0_11] : memref<2x16x256xf32, #tpu.memory_space<vmem>>, vector<1x16x256xf32>
    %7 = vector.shape_cast %6 : vector<1x16x256xf32> to vector<16x256xf32>
    %8 = arith.truncf %7 : vector<16x256xf32> to vector<16x256xbf16>
    %cst = arith.constant dense<0.000000e+00> : vector<8x256xf32>
    %9 = tpu.matmul %3, %8, %cst {dimension_numbers = #tpu.dot_dimension_numbers<[1], [0], [0], [1], [0, 0, 1, 1], [], []>} : vector<8x16xbf16>, vector<16x256xbf16>, vector<8x256xf32> -> vector<8x256xf32>
    %10 = vector.broadcast %0 : vector<8x1xf32> to vector<8x256xf32>
    %11 = arith.addf %9, %10 : vector<8x256xf32>
    %cst_12 = arith.constant 0.000000e+00 : f32
    %12 = vector.broadcast %cst_12 : f32 to vector<8x256xf32>
    %13 = arith.maximumf %11, %12 : vector<8x256xf32>
    %c17_i32 = arith.constant 17 : i32
    %14 = tpu.dynamic_rotate %13 by %c17_i32 dim 1 : vector<8x256xf32>, i32 -> vector<8x256xf32>
    %c0_13 = arith.constant 0 : index
    %c0_14 = arith.constant 0 : index
    %15 = vector.load %arg6[%c0_13, %c0_14] : memref<9x256xf32, #tpu.memory_space<vmem>>, vector<1x256xf32>
    %16 = vector.broadcast %15 : vector<1x256xf32> to vector<8x256xf32>
    %17 = arith.mulf %14, %16 : vector<8x256xf32>
    %c16_i32 = arith.constant 16 : i32
    %18 = tpu.dynamic_rotate %13 by %c16_i32 dim 1 : vector<8x256xf32>, i32 -> vector<8x256xf32>
    %c1 = arith.constant 1 : index
    %c0_15 = arith.constant 0 : index
    %19 = vector.load %arg6[%c1, %c0_15] : memref<9x256xf32, #tpu.memory_space<vmem>>, vector<1x256xf32>
    %20 = vector.broadcast %19 : vector<1x256xf32> to vector<8x256xf32>
    %21 = arith.mulf %18, %20 : vector<8x256xf32>
    %c15_i32 = arith.constant 15 : i32
    %22 = tpu.dynamic_rotate %13 by %c15_i32 dim 1 : vector<8x256xf32>, i32 -> vector<8x256xf32>
    %c2 = arith.constant 2 : index
    %c0_16 = arith.constant 0 : index
    %23 = vector.load %arg6[%c2, %c0_16] : memref<9x256xf32, #tpu.memory_space<vmem>>, vector<1x256xf32>
    %24 = vector.broadcast %23 : vector<1x256xf32> to vector<8x256xf32>
    %25 = arith.mulf %22, %24 : vector<8x256xf32>
    %c1_i32 = arith.constant 1 : i32
    %26 = tpu.dynamic_rotate %13 by %c1_i32 dim 1 : vector<8x256xf32>, i32 -> vector<8x256xf32>
    %c3 = arith.constant 3 : index
    %c0_17 = arith.constant 0 : index
    %27 = vector.load %arg6[%c3, %c0_17] : memref<9x256xf32, #tpu.memory_space<vmem>>, vector<1x256xf32>
    %28 = vector.broadcast %27 : vector<1x256xf32> to vector<8x256xf32>
    %29 = arith.mulf %26, %28 : vector<8x256xf32>
    %c255_i32 = arith.constant 255 : i32
    %30 = tpu.dynamic_rotate %13 by %c255_i32 dim 1 : vector<8x256xf32>, i32 -> vector<8x256xf32>
    %c5 = arith.constant 5 : index
    %c0_18 = arith.constant 0 : index
    %31 = vector.load %arg6[%c5, %c0_18] : memref<9x256xf32, #tpu.memory_space<vmem>>, vector<1x256xf32>
    %32 = vector.broadcast %31 : vector<1x256xf32> to vector<8x256xf32>
    %33 = arith.mulf %30, %32 : vector<8x256xf32>
    %c241_i32 = arith.constant 241 : i32
    %34 = tpu.dynamic_rotate %13 by %c241_i32 dim 1 : vector<8x256xf32>, i32 -> vector<8x256xf32>
    %c6 = arith.constant 6 : index
    %c0_19 = arith.constant 0 : index
    %35 = vector.load %arg6[%c6, %c0_19] : memref<9x256xf32, #tpu.memory_space<vmem>>, vector<1x256xf32>
    %36 = vector.broadcast %35 : vector<1x256xf32> to vector<8x256xf32>
    %37 = arith.mulf %34, %36 : vector<8x256xf32>
    %c240_i32 = arith.constant 240 : i32
    %38 = tpu.dynamic_rotate %13 by %c240_i32 dim 1 : vector<8x256xf32>, i32 -> vector<8x256xf32>
    %c7 = arith.constant 7 : index
    %c0_20 = arith.constant 0 : index
    %39 = vector.load %arg6[%c7, %c0_20] : memref<9x256xf32, #tpu.memory_space<vmem>>, vector<1x256xf32>
    %40 = vector.broadcast %39 : vector<1x256xf32> to vector<8x256xf32>
    %41 = arith.mulf %38, %40 : vector<8x256xf32>
    %c239_i32 = arith.constant 239 : i32
    %42 = tpu.dynamic_rotate %13 by %c239_i32 dim 1 : vector<8x256xf32>, i32 -> vector<8x256xf32>
    %c8_21 = arith.constant 8 : index
    %c0_22 = arith.constant 0 : index
    %43 = vector.load %arg6[%c8_21, %c0_22] : memref<9x256xf32, #tpu.memory_space<vmem>>, vector<1x256xf32>
    %44 = vector.broadcast %43 : vector<1x256xf32> to vector<8x256xf32>
    %45 = arith.mulf %42, %44 : vector<8x256xf32>
    %46 = tpu.concatenate %17, %21, %25, %29, %13, %33, %37, %41, %45 in 0 : vector<8x256xf32>, vector<8x256xf32>, vector<8x256xf32>, vector<8x256xf32>, vector<8x256xf32>, vector<8x256xf32>, vector<8x256xf32>, vector<8x256xf32>, vector<8x256xf32> -> vector<72x256xf32>
    %47 = arith.truncf %46 : vector<72x256xf32> to vector<72x256xbf16>
    %cst_23 = arith.constant dense<0.000000e+00> : vector<8x256xf32>
    %48 = tpu.matmul %4, %47, %cst_23 {dimension_numbers = #tpu.dot_dimension_numbers<[1], [0], [0], [1], [0, 0, 1, 1], [], []>} : vector<8x72xbf16>, vector<72x256xbf16>, vector<8x256xf32> -> vector<8x256xf32>
    %49 = vector.broadcast %1 : vector<8x1xf32> to vector<8x256xf32>
    %50 = arith.addf %48, %49 : vector<8x256xf32>
    %cst_24 = arith.constant 0.000000e+00 : f32
    %51 = vector.broadcast %cst_24 : f32 to vector<8x256xf32>
    %52 = arith.maximumf %50, %51 : vector<8x256xf32>
    %53 = arith.truncf %52 : vector<8x256xf32> to vector<8x256xbf16>
    %cst_25 = arith.constant dense<0.000000e+00> : vector<16x256xf32>
    %54 = tpu.matmul %5, %53, %cst_25 {dimension_numbers = #tpu.dot_dimension_numbers<[1], [0], [0], [1], [0, 0, 1, 1], [], []>} : vector<16x8xbf16>, vector<8x256xbf16>, vector<16x256xf32> -> vector<16x256xf32>
    %55 = vector.broadcast %2 : vector<16x1xf32> to vector<16x256xf32>
    %56 = arith.addf %54, %55 : vector<16x256xf32>
    %57 = arith.addf %56, %7 : vector<16x256xf32>
    %cst_26 = arith.constant 0.000000e+00 : f32
    %58 = vector.broadcast %cst_26 : f32 to vector<16x256xf32>
    %59 = arith.maximumf %57, %58 : vector<16x256xf32>
    %c0_27 = arith.constant 0 : index
    %c0_28 = arith.constant 0 : index
    %c0_29 = arith.constant 0 : index
    %60 = vector.load %arg7[%c0_27, %c0_28, %c0_29] : memref<2x16x256xf32, #tpu.memory_space<vmem>>, vector<1x16x256xf32>
    %61 = vector.shape_cast %60 : vector<1x16x256xf32> to vector<16x256xf32>
    %62 = vector.shape_cast %59 : vector<16x256xf32> to vector<1x16x256xf32>
    tpu.vector_store %arg7[%c0_27, %c0_28, %c0_29], %62 {strides = array<i32>} : memref<2x16x256xf32, #tpu.memory_space<vmem>>, vector<1x16x256xf32>,
    %c1_30 = arith.constant 1 : index
    %c0_31 = arith.constant 0 : index
    %c0_32 = arith.constant 0 : index
    %63 = vector.load %arg1[%c1_30, %c0_31, %c0_32] : memref<2x16x256xf32, #tpu.memory_space<vmem>>, vector<1x16x256xf32>
    %64 = vector.shape_cast %63 : vector<1x16x256xf32> to vector<16x256xf32>
    %65 = arith.truncf %64 : vector<16x256xf32> to vector<16x256xbf16>
    %cst_33 = arith.constant dense<0.000000e+00> : vector<8x256xf32>
    %66 = tpu.matmul %3, %65, %cst_33 {dimension_numbers = #tpu.dot_dimension_numbers<[1], [0], [0], [1], [0, 0, 1, 1], [], []>} : vector<8x16xbf16>, vector<16x256xbf16>, vector<8x256xf32> -> vector<8x256xf32>
    %67 = vector.broadcast %0 : vector<8x1xf32> to vector<8x256xf32>
    %68 = arith.addf %66, %67 : vector<8x256xf32>
    %cst_34 = arith.constant 0.000000e+00 : f32
    %69 = vector.broadcast %cst_34 : f32 to vector<8x256xf32>
    %70 = arith.maximumf %68, %69 : vector<8x256xf32>
    %c17_i32_35 = arith.constant 17 : i32
    %71 = tpu.dynamic_rotate %70 by %c17_i32_35 dim 1 : vector<8x256xf32>, i32 -> vector<8x256xf32>
    %c0_36 = arith.constant 0 : index
    %c0_37 = arith.constant 0 : index
    %72 = vector.load %arg6[%c0_36, %c0_37] : memref<9x256xf32, #tpu.memory_space<vmem>>, vector<1x256xf32>
    %73 = vector.broadcast %72 : vector<1x256xf32> to vector<8x256xf32>
    %74 = arith.mulf %71, %73 : vector<8x256xf32>
    %c16_i32_38 = arith.constant 16 : i32
    %75 = tpu.dynamic_rotate %70 by %c16_i32_38 dim 1 : vector<8x256xf32>, i32 -> vector<8x256xf32>
    %c1_39 = arith.constant 1 : index
    %c0_40 = arith.constant 0 : index
    %76 = vector.load %arg6[%c1_39, %c0_40] : memref<9x256xf32, #tpu.memory_space<vmem>>, vector<1x256xf32>
    %77 = vector.broadcast %76 : vector<1x256xf32> to vector<8x256xf32>
    %78 = arith.mulf %75, %77 : vector<8x256xf32>
    %c15_i32_41 = arith.constant 15 : i32
    %79 = tpu.dynamic_rotate %70 by %c15_i32_41 dim 1 : vector<8x256xf32>, i32 -> vector<8x256xf32>
    %c2_42 = arith.constant 2 : index
    %c0_43 = arith.constant 0 : index
    %80 = vector.load %arg6[%c2_42, %c0_43] : memref<9x256xf32, #tpu.memory_space<vmem>>, vector<1x256xf32>
    %81 = vector.broadcast %80 : vector<1x256xf32> to vector<8x256xf32>
    %82 = arith.mulf %79, %81 : vector<8x256xf32>
    %c1_i32_44 = arith.constant 1 : i32
    %83 = tpu.dynamic_rotate %70 by %c1_i32_44 dim 1 : vector<8x256xf32>, i32 -> vector<8x256xf32>
    %c3_45 = arith.constant 3 : index
    %c0_46 = arith.constant 0 : index
    %84 = vector.load %arg6[%c3_45, %c0_46] : memref<9x256xf32, #tpu.memory_space<vmem>>, vector<1x256xf32>
    %85 = vector.broadcast %84 : vector<1x256xf32> to vector<8x256xf32>
    %86 = arith.mulf %83, %85 : vector<8x256xf32>
    %c255_i32_47 = arith.constant 255 : i32
    %87 = tpu.dynamic_rotate %70 by %c255_i32_47 dim 1 : vector<8x256xf32>, i32 -> vector<8x256xf32>
    %c5_48 = arith.constant 5 : index
    %c0_49 = arith.constant 0 : index
    %88 = vector.load %arg6[%c5_48, %c0_49] : memref<9x256xf32, #tpu.memory_space<vmem>>, vector<1x256xf32>
    %89 = vector.broadcast %88 : vector<1x256xf32> to vector<8x256xf32>
    %90 = arith.mulf %87, %89 : vector<8x256xf32>
    %c241_i32_50 = arith.constant 241 : i32
    %91 = tpu.dynamic_rotate %70 by %c241_i32_50 dim 1 : vector<8x256xf32>, i32 -> vector<8x256xf32>
    %c6_51 = arith.constant 6 : index
    %c0_52 = arith.constant 0 : index
    %92 = vector.load %arg6[%c6_51, %c0_52] : memref<9x256xf32, #tpu.memory_space<vmem>>, vector<1x256xf32>
    %93 = vector.broadcast %92 : vector<1x256xf32> to vector<8x256xf32>
    %94 = arith.mulf %91, %93 : vector<8x256xf32>
    %c240_i32_53 = arith.constant 240 : i32
    %95 = tpu.dynamic_rotate %70 by %c240_i32_53 dim 1 : vector<8x256xf32>, i32 -> vector<8x256xf32>
    %c7_54 = arith.constant 7 : index
    %c0_55 = arith.constant 0 : index
    %96 = vector.load %arg6[%c7_54, %c0_55] : memref<9x256xf32, #tpu.memory_space<vmem>>, vector<1x256xf32>
    %97 = vector.broadcast %96 : vector<1x256xf32> to vector<8x256xf32>
    %98 = arith.mulf %95, %97 : vector<8x256xf32>
    %c239_i32_56 = arith.constant 239 : i32
    %99 = tpu.dynamic_rotate %70 by %c239_i32_56 dim 1 : vector<8x256xf32>, i32 -> vector<8x256xf32>
    %c8_57 = arith.constant 8 : index
    %c0_58 = arith.constant 0 : index
    %100 = vector.load %arg6[%c8_57, %c0_58] : memref<9x256xf32, #tpu.memory_space<vmem>>, vector<1x256xf32>
    %101 = vector.broadcast %100 : vector<1x256xf32> to vector<8x256xf32>
    %102 = arith.mulf %99, %101 : vector<8x256xf32>
    %103 = tpu.concatenate %74, %78, %82, %86, %70, %90, %94, %98, %102 in 0 : vector<8x256xf32>, vector<8x256xf32>, vector<8x256xf32>, vector<8x256xf32>, vector<8x256xf32>, vector<8x256xf32>, vector<8x256xf32>, vector<8x256xf32>, vector<8x256xf32> -> vector<72x256xf32>
    %104 = arith.truncf %103 : vector<72x256xf32> to vector<72x256xbf16>
    %cst_59 = arith.constant dense<0.000000e+00> : vector<8x256xf32>
    %105 = tpu.matmul %4, %104, %cst_59 {dimension_numbers = #tpu.dot_dimension_numbers<[1], [0], [0], [1], [0, 0, 1, 1], [], []>} : vector<8x72xbf16>, vector<72x256xbf16>, vector<8x256xf32> -> vector<8x256xf32>
    %106 = vector.broadcast %1 : vector<8x1xf32> to vector<8x256xf32>
    %107 = arith.addf %105, %106 : vector<8x256xf32>
    %cst_60 = arith.constant 0.000000e+00 : f32
    %108 = vector.broadcast %cst_60 : f32 to vector<8x256xf32>
    %109 = arith.maximumf %107, %108 : vector<8x256xf32>
    %110 = arith.truncf %109 : vector<8x256xf32> to vector<8x256xbf16>
    %cst_61 = arith.constant dense<0.000000e+00> : vector<16x256xf32>
    %111 = tpu.matmul %5, %110, %cst_61 {dimension_numbers = #tpu.dot_dimension_numbers<[1], [0], [0], [1], [0, 0, 1, 1], [], []>} : vector<16x8xbf16>, vector<8x256xbf16>, vector<16x256xf32> -> vector<16x256xf32>
    %112 = vector.broadcast %2 : vector<16x1xf32> to vector<16x256xf32>
    %113 = arith.addf %111, %112 : vector<16x256xf32>
    %114 = arith.addf %113, %64 : vector<16x256xf32>
    %cst_62 = arith.constant 0.000000e+00 : f32
    %115 = vector.broadcast %cst_62 : f32 to vector<16x256xf32>
    %116 = arith.maximumf %114, %115 : vector<16x256xf32>
    %c1_63 = arith.constant 1 : index
    %c0_64 = arith.constant 0 : index
    %c0_65 = arith.constant 0 : index
    %117 = vector.load %arg7[%c1_63, %c0_64, %c0_65] : memref<2x16x256xf32, #tpu.memory_space<vmem>>, vector<1x16x256xf32>
    %118 = vector.shape_cast %117 : vector<1x16x256xf32> to vector<16x256xf32>
    %119 = vector.shape_cast %116 : vector<16x256xf32> to vector<1x16x256xf32>
    tpu.vector_store %arg7[%c1_63, %c0_64, %c0_65], %119 {strides = array<i32>} : memref<2x16x256xf32, #tpu.memory_space<vmem>>, vector<1x16x256xf32>,
    return
  }
  func.func @transform_0(%arg0: i32) -> (i32, i32, i32) {
    %c0_i32 = arith.constant 0 : i32
    %c0_i32_0 = arith.constant 0 : i32
    %c0_i32_1 = arith.constant 0 : i32
    return %arg0, %c0_i32, %c0_i32_0 : i32, i32, i32
  }
  func.func @transform_1(%arg0: i32) -> (i32, i32) {
    %c0_i32 = arith.constant 0 : i32
    %c0_i32_0 = arith.constant 0 : i32
    %c0_i32_1 = arith.constant 0 : i32
    return %c0_i32, %c0_i32_0 : i32, i32
  }
  func.func @transform_2(%arg0: i32) -> (i32, i32) {
    %c0_i32 = arith.constant 0 : i32
    %c0_i32_0 = arith.constant 0 : i32
    %c0_i32_1 = arith.constant 0 : i32
    return %c0_i32, %c0_i32_0 : i32, i32
  }
  func.func @transform_3(%arg0: i32) -> (i32, i32) {
    %c0_i32 = arith.constant 0 : i32
    %c0_i32_0 = arith.constant 0 : i32
    %c0_i32_1 = arith.constant 0 : i32
    return %c0_i32, %c0_i32_0 : i32, i32
  }
  func.func @transform_4(%arg0: i32) -> (i32, i32) {
    %c0_i32 = arith.constant 0 : i32
    %c0_i32_0 = arith.constant 0 : i32
    %c0_i32_1 = arith.constant 0 : i32
    return %c0_i32, %c0_i32_0 : i32, i32
  }
  func.func @transform_5(%arg0: i32) -> (i32, i32) {
    %c0_i32 = arith.constant 0 : i32
    %c0_i32_0 = arith.constant 0 : i32
    %c0_i32_1 = arith.constant 0 : i32
    return %c0_i32, %c0_i32_0 : i32, i32
  }
  func.func @transform_6(%arg0: i32) -> (i32, i32, i32) {
    %c0_i32 = arith.constant 0 : i32
    %c0_i32_0 = arith.constant 0 : i32
    %c0_i32_1 = arith.constant 0 : i32
    return %arg0, %c0_i32, %c0_i32_0 : i32, i32, i32
  }
}

</mosaic_0001>

<bundles_post_ra>
// kernel: tpu_custom_call.1
= control target key start
LH: loop header
LB: loop body
LE: loop exit
PB: predicated region body
PF: predicated region fallthrough
CT: control target
= control target key end

     0   :  { %11 = vsyncpa [#allocation3], 0  ;;  %s1871_s0 = inlined_call_operand.hbm [shape: f32[4,16,256], index: 0, kind: input, shape index: {}]   ;;  %s1872_s1 = inlined_call_operand.vmem [shape: bf16[8,16], index: 1, kind: input, shape index: {}]   ;;  %s1873_s2 = inlined_call_operand.vmem [shape: bf16[8,72], index: 2, kind: input, shape index: {}]   ;;  %s1874_s3 = inlined_call_operand.vmem [shape: bf16[16,8], index: 3, kind: input, shape index: {}]   ;;  %s1875_s4 = inlined_call_operand.vmem [shape: f32[32,1], index: 4, kind: input, shape index: {}]   ;;  %s1876_s5 = inlined_call_operand.vmem [shape: f32[9,256], index: 5, kind: input, shape index: {}]   ;;  %s1877_s6 = inlined_call_operand.hbm [shape: f32[4,16,256], index: 6, kind: output, shape index: {}]  }
   0x1   :  { %13 = vsyncpa [#allocation3 + $0x1], 0 }
   0x2   :  { %14 = vsyncpa [#allocation4], 0 }
   0x3   :  { %16 = vsyncpa [#allocation4 + $0x1], 0  ;;  %s1346_s21 = smov 0   ;;  %s1348_s22 = smov 0  }
   0x4   :  { %s1350_s23 = smov 0   ;;  %s1352_s24 = smov 0  }
   0x5 LB: > { %s1367_s25 = sadd.s32 4294967295, %s1295_s24   ;;  %s1089_s26 = sadd.s32 4294967294, %s1295_s24   ;;  %s1295_s24 = sphi %s1352_s24, %s1897_s24   ;;  %s1291_s23 = sphi %s1350_s23, %s1896_s23   ;;  %s1287_s22 = sphi %s1348_s22, %s1895_s22   ;;  %s1283_s21 = sphi %s1346_s21, %s1894_s21  }
   0x6   : > { %s1371_s27 = sadd.s32 1, %s1295_s24   ;;  %s29_s28 = sadd.s32 1, %s1291_s23 }
   0x7   : > { %s26_s29 = ssub.s32 %s1295_s24, %s1371_s27  ;;  %p36_p0 = scmp.ne.s32.totalorder %s1291_s23, %s1287_s22 }
   0x8   : > { %p27_p1 = scmp.eq.s32.totalorder %s26_s29, 0  ;;  %p37_p2 = scmp.eq.s32.totalorder %s1295_s24, 0 }
   0x9   : > { %p42_p3 = scmp.ne.s32.totalorder %s1287_s22, %s1283_s21  ;;  %p43_p4 = scmp.eq.s32.totalorder %s1367_s25, 0 }
   0xa   : > { %s1383_s30 = scalar_select %p27_p1, %s1291_s23, %s29_s28  }
   0xb   : > { %p1385_p5 = por %p37_p2, %p36_p0  ;;  %p1389_p6 = por %p43_p4, %p42_p3 }
   0xc   : > { %p171_p7 = scmp.eq.s32.totalorder %s1367_s25, 1  ;;  %p177_p8 = scmp.eq.s32.totalorder %s1089_s26, 1 }
   0xd   : > { %s1884_s8 = scalar_select %p1389_p6, 1, 0 }
   0xe   : > { %p1154_p10 = scmp.lt.s32.totalorder %s1295_s24, 2  ;;  %p1396_p11 = por %p171_p7, %p36_p0 }
   0xf   : > { %p1400_p12 = por %p177_p8, %p42_p3  ;;  %s212_s11 = sand.u32 1, %s1291_s23  }
  0x10   : > { %s1885_s9 = scalar_select %p1396_p11, 1, 0 }
  0x11   : > { %s1886_s10 = scalar_select %p1400_p12, 1, 0 }
  0x12   : > { %s1139_s12 = sshll.u32 %s1295_s24, 10  ;;  %s1092_s13 = sshll.u32 %s212_s11, 6 }
  0x13   : > { %s1409_s16 = scalar_lea.hbm %s1871_s0, %s1139_s12  ;;  %s216_s17 = scalar_lea.vmem [#allocation2], %s1092_s13 }
  0x14   : > { %s224_s18 = sshll.u32 %s216_s17, 4  ;;  %p1413_p13 = pnand %p1154_p10, %p1385_p5  ;;  %s1417_s18 = int_to_ptr.vmem [resolvable:$true] %s224_s18 }
  0x15   : > { %s1419_s20 = scalar_lea.sflag [#allocation3], %s212_s11  ;;  %s1203_s26 = scalar_lea.hbm %s1409_s16, 1024 }
  0x16   : > { %p1204_p0 = scmp.ne.s32.totalorder %s1409_s16, %s1203_s26  ;;  %p1205_p1 = pneg %p1413_p13 }
  0x17   : > { %s1208_s12 = scalar_lea.hbm %s1871_s0, 2048  ;;  %p1209_p4 = scmp.lt.s32.totalorder %s1409_s16, %s1871_s0 }
  0x18   : > { %p1206_p2 = pnand %p1205_p1, %p1204_p0  ;;  %p1210_p5 = scmp.lt.s32.totalorder %s1208_s12, %s1203_s26 }
  0x1a   : > { %p1207_p3 = pneg %p1206_p2  ;;  %p1211_p7 = por %p1210_p5, %p1209_p4 }
  0x1c   : > { %p1212_p8 = pnand %p1211_p7, %p1207_p3 }
  0x1e   : > { %1215 = shalt.err (!%p1212_p8)
}
  0x1f   : > { %s1216_s11 = scalar_lea.vmem %s1417_s18, 1024  ;;  %s1297_s14 = smov [#allocation2]  }
  0x20   : > { %p1217_p10 = scmp.ne.s32.totalorder %s1417_s18, %s1216_s11  ;;  %s1221_s15 = sshll.u32 %s1297_s14, 4  ;;  %s1222_s15 = int_to_ptr.vmem [resolvable:$false] %s1221_s15 }
  0x21   : > { %s1223_s17 = scalar_lea.vmem %s1222_s15, 2048  ;;  %p1224_p2 = scmp.lt.s32.totalorder %s1417_s18, %s1222_s15 }
  0x22   : > { %p1219_p9 = pnand %p1217_p10, %p1205_p1  ;;  %p1225_p12 = scmp.lt.s32.totalorder %s1223_s17, %s1216_s11 }
  0x24   : > { %p1220_p0 = pneg %p1219_p9  ;;  %p1226_p11 = por %p1225_p12, %p1224_p2 }
  0x26   : > { %p1227_p6 = pnand %p1226_p11, %p1220_p0 }
  0x28   : > { %1230 = shalt.err (!%p1227_p6)
}
  0x29   : > { %s1298_s26 = smov 256   ;;  %s1299_s28 = smov 16  }
  0x2a   : > { %1149 = dma.hbm_to_vmem [thread:$0]  (!%p1413_p13), %s1409_s16, 1024, %s1417_s18, %s1419_s20, %s1298_s26, %s1298_s26, %s1299_s28  }
  0x2b   : > { %p1096_p9 = scmp.ge.s32.totalorder %s1295_s24, 1  ;;  %p232_p1 = scmp.lt.s32.totalorder %s1295_s24, 3 }
  0x2d   : > { %p233_p3 = pnand %p1096_p9, %p232_p1 }
  0x2e   : > { %s1443_s29 = sand.u32 (!%p233_p3), 1, %s1287_s22   ;;  %p1888_p6 = scmp.ne.s32.totalorder (!%p233_p3), %s1884_s8, 0 }
  0x2f   : > { %236 = sbr.rel (%p233_p3) target bundleno = 1397 (0x575), region = 44  ;;  %s1880_s12 = sshll.u32 (!%p233_p3), %s1443_s29, 6 }
  0x30   : > { %s239_s7 = scalar_lea.sflag (!%p233_p3), [#allocation3], %s1443_s29  ;;  %s1449_s13 = scalar_lea.vmem (!%p233_p3), [#allocation2], %s1880_s12 }
  0x34   : > { %1274 = dma.done.wait (%p1888_p6), %s239_s7, 1024  }
  0x35   : > { %1276 = vsyncadd (%p1888_p6), %s239_s7, 4294966272  ;;  %v1300_v0 = vmov 0   ;;  %v1460_v1 = vld [vmem:[%s1449_s13 + $0x8] sm:$0xff]  ;;  %v1463_v2 = vld [vmem:[%s1449_s13 + $0x18] sm:$0xff]  ;;  %vm293_vm0 = vcmask 130048   ;;  %s1301_s20 = smov 113   ;;  %v344_v21 = vlaneseq }
  0x36   : > { %329 = vmatprep.mubr.bf16.mxu1 %v1300_v0  ;;  %1200 = vset.pattern.permute.xlu0 %v1300_v0  ;;  %v1466_v3 = vld [vmem:[%s1449_s13] sm:$0xff]  ;;  %v287_v4 = vpack.c.bf16 %v1463_v2, %v1460_v1  ;;  %v1471_v5 = vld [vmem:[%s1449_s13 + $0x10] sm:$0xff]  ;;  %s1302_s11 = smov 111   ;;  %s1303_s14 = smov 112   ;;  %v275_v18 = vld [vmem:[%s1875_s4 + $0x8] sm:$0xff]  ;;  %vm536_vm5 = vcmask 1043456  }
  0x37   : > { %1201 = vset.pattern.permute.xlu1 %v1300_v0  ;;  %645 = vmatprep.mubr.bf16.mxu0 %v1300_v0  ;;  %v274_v6 = vld [vmem:[%s1875_s4] sm:$0xff]  ;;  %v286_v7 = vpack.c.bf16 %v1471_v5, %v1466_v3  ;;  %s1304_s15 = smov 127   ;;  %s1305_s17 = smov 15   ;;  %v352_v23 = vshrl.u32 %v344_v21, 7  ;;  %v1529_v25 = vand.u32 127, %v344_v21  ;;  %vm532_vm10 = vcmask 588800  }
  0x38   : > { %290 = vperm.xlu0 %1200, %v274_v6   ;;  %311 = vmatprep.subr.bf16.mxu1 %v287_v4  ;;  %v1481_v8 = vld [vmem:[%s1872_s1] sm:$0xf]  ;;  %s1306_s26 = smov 1   ;;  %s1881_s28 = smov 17   ;;  %vm603_vm11 = vcmask 64512  }
  0x39   : > { %312 = vmatpush1.bf16.msra.mxu1 %v286_v7  ;;  %s1308_s7 = smov 16   ;;  %v1105_v26 = vld [vmem:[%s1876_s5 + $0x7] ss:$8 sm:$0x3]  ;;  %v1537_v28 = vsub.s32 0, %v352_v23  ;;  %v1539_v29 = vsub.s32 1, %v352_v23 }
  0x3a   : > { %v1106_v27 = vld [vmem:[%s1876_s5 + $0x10] ss:$8 sm:$0x3]  ;;  %vm477_vm1 = vcmp.lt.s32.totalorder %v1529_v25, 112  ;;  %vm455_vm2 = vcmp.lt.s32.totalorder %v1529_v25, 113  ;;  %vm499_vm3 = vcmp.lt.s32.totalorder %v1529_v25, 111 }
  0x3b   : > { %v1104_v32 = vld [vmem:[%s1876_s5 + $0x6] ss:$8 sm:$0x3]  ;;  %v490_v33 = vrot.slane %v1105_v26, %v1539_v29  ;;  %v508_v34 = vrot.slane %v1106_v27, %v1537_v28  ;;  %v512_v35 = vrot.slane %v1106_v27, %v1539_v29  ;;  %v1103_v36 = vld [vmem:[%s1876_s5 + $0x5] ss:$8 sm:$0x3]  ;;  %v486_v39 = vrot.slane %v1105_v26, %v1537_v28 }
  0x3c   : > { %1099 = vmatmul.mubr.msk.bf16.vlgmr.msra.gmra.mxu1 %vm293_vm0, %v1481_v8  ;;  %v468_v38 = vrot.slane %v1104_v32, %v1539_v29  ;;  %vm433_vm4 = vcmp.lt.s32.totalorder %v1529_v25, 127  ;;  %v446_v45 = vrot.slane %v1103_v36, %v1539_v29  ;;  %v1102_v50 = vld [vmem:[%s1876_s5 + $0x3] ss:$8 sm:$0x3]  ;;  %v464_v51 = vrot.slane %v1104_v32, %v1537_v28  ;;  %s1890_s19 = sshll.u32 %s1443_s29, 6  ;;  %s1141_s16 = sshll.u32 %s1367_s25, 10 }
  0x3d   : > { %575 = vmatprep.mubr.bf16.mxu1 %v1300_v0  ;;  %v442_v52 = vrot.slane %v1103_v36, %v1537_v28  ;;  %vm389_vm6 = vcmp.lt.s32.totalorder %v1529_v25, 15  ;;  %v1101_v61 = vld [vmem:[%s1876_s5 + $0x2] ss:$8 sm:$0x3]  ;;  %vm411_vm7 = vcmp.lt.s32.totalorder %v1529_v25, 1  ;;  %v424_v62 = vrot.slane %v1102_v50, %v1539_v29  ;;  %s1800_s8 = scalar_lea.vmem [#allocation5], %s1890_s19 }
  0x3e   : > { %v398_v26 = vrot.slane %v1101_v61, %v1537_v28  ;;  %v1100_v27 = vld [vmem:[%s1876_s5 + $0x1] ss:$8 sm:$0x3]  ;;  %vm346_vm8 = vcmp.lt.s32.totalorder %v1529_v25, 17  ;;  %vm367_vm9 = vcmp.lt.s32.totalorder %v1529_v25, 16  ;;  %s1016_s12 = sshll.u32 %s1800_s8, 4  ;;  %s1826_s12 = int_to_ptr.vmem [resolvable:$true] %s1016_s12 }
  0x3f   : > { %s1231_s25 = scalar_lea.vmem %s1826_s12, 1024  ;;  %p1891_p12 = scmp.ne.s32.totalorder %s1885_s9, 0 }
  0x40   : > { %p1232_p11 = scmp.ne.s32.totalorder %s1826_s12, %s1231_s25 }
  0x42   : > { %p1233_p13 = pnand %p1232_p11, %p1891_p12 }
  0x44   : > { %p1234_p4 = pneg %p1233_p13 }
  0xb3   : > { %v1486_v9 = vpop.permute.xlu0 %290 }
  0xfc   : > { %v331_v10 = vpop.f32.mrf.mxu1 }
  0xfd   : > { %v332_v11 = vadd.f32 %v331_v10, %v1486_v9 }
  0xfe   : > { %v333_v12 = vpop.f32.mrf.mxu1 }
  0xff   : > { %v1489_v13 = vmax.f32 %v332_v11, 0.0  ;;  %v334_v14 = vadd.f32 %v333_v12, %v1486_v9  ;;  %v402_v11 = vrot.slane %v1101_v61, %v1539_v29  ;;  %v1632_v61 = vld [vmem:[%s1449_s13 + $0x28] sm:$0xff] }
 0x100   : > { %v335_v15 = vpop.f32.mrf.mxu1 }
 0x101   : > { %451 = vrot.lane.b32.xlu1 %v1489_v13, %s1301_s20  ;;  %495 = vrot.lane.b32.xlu0 %v1489_v13, %s1302_s11  ;;  %v1496_v17 = vmax.f32 %v334_v14, 0.0  ;;  %v420_v14 = vrot.slane %v1102_v50, %v1537_v28 }
 0x102   : > { %v336_v16 = vpop.f32.mrf.mxu1 }
 0x105   : > { %473 = vrot.lane.b32.xlu1 %v1489_v13, %s1303_s14  ;;  %453 = vrot.lane.b32.xlu0 %v1496_v17, %s1301_s20 }
 0x109   : > { %429 = vrot.lane.b32.xlu1 %v1489_v13, %s1304_s15  ;;  %475 = vrot.lane.b32.xlu0 %v1496_v17, %s1303_s14 }
 0x10d   : > { %497 = vrot.lane.b32.xlu1 %v1496_v17, %s1302_s11  ;;  %431 = vrot.lane.b32.xlu0 %v1496_v17, %s1304_s15 }
 0x111   : > { %385 = vrot.lane.b32.xlu1 %v1489_v13, %s1305_s17  ;;  %387 = vrot.lane.b32.xlu0 %v1496_v17, %s1305_s17 }
 0x115   : > { %407 = vrot.lane.b32.xlu1 %v1489_v13, %s1306_s26  ;;  %409 = vrot.lane.b32.xlu0 %v1496_v17, %s1306_s26 }
 0x119   : > { %340 = vrot.lane.b32.xlu1 %v1489_v13, %s1881_s28  ;;  %342 = vrot.lane.b32.xlu0 %v1496_v17, %s1881_s28 }
 0x11d   : > { %363 = vrot.lane.b32.xlu1 %v1489_v13, %s1308_s7  ;;  %365 = vrot.lane.b32.xlu0 %v1496_v17, %s1308_s7 }
 0x121   : > { %529 = vperm.xlu1 %1201, %v275_v18  }
 0x173   : > { %v452_v19 = vpop.permute.xlu1 %451  ;;  %v496_v20 = vpop.permute.xlu0 %495 }
 0x177   : > { %v474_v22 = vpop.permute.xlu1 %473  ;;  %v454_v24 = vpop.permute.xlu0 %453 }
 0x178   : > { %v457_v42 = vsel %vm455_vm2, %v454_v24, %v452_v19  ;;  %v456_v54 = vsel %vm455_vm2, %v452_v19, %v454_v24  ;;  %v349_v24 = vld [vmem:[%s1876_s5] ss:$8 sm:$0x3] }
 0x179   : > { %v472_v55 = vmul.f32 %v468_v38, %v457_v42  ;;  %v471_v10 = vmul.f32 %v464_v51, %v456_v54  ;;  %v358_v36 = vrot.slane %v349_v24, %v1539_v29  ;;  %v376_v38 = vrot.slane %v1100_v27, %v1537_v28 }
 0x17b   : > { %v430_v30 = vpop.permute.xlu1 %429  ;;  %v476_v31 = vpop.permute.xlu0 %475 }
 0x17c   : > { %v479_v37 = vsel %vm477_vm1, %v476_v31, %v474_v22  ;;  %v478_v46 = vsel %vm477_vm1, %v474_v22, %v476_v31 }
 0x17d   : > { %v494_v47 = vmul.f32 %v490_v33, %v479_v37  ;;  %v493_v60 = vmul.f32 %v486_v39, %v478_v46  ;;  %v380_v39 = vrot.slane %v1100_v27, %v1539_v29 }
 0x17f   : > { %v498_v40 = vpop.permute.xlu1 %497  ;;  %v432_v41 = vpop.permute.xlu0 %431  ;;  %v524_v7 = vpack.c.bf16 %v494_v47, %v472_v55  ;;  %v523_v16 = vpack.c.bf16 %v493_v60, %v471_v10 }
 0x180   : > { %v500_v43 = vsel %vm499_vm3, %v496_v20, %v498_v40  ;;  %v501_v44 = vsel %vm499_vm3, %v498_v40, %v496_v20  ;;  %v435_v53 = vsel %vm433_vm4, %v432_v41, %v430_v30  ;;  %v434_v63 = vsel %vm433_vm4, %v430_v30, %v432_v41 }
 0x181   : > { %v515_v48 = vmul.f32 %v508_v34, %v500_v43  ;;  %v516_v49 = vmul.f32 %v512_v35, %v501_v44  ;;  %v450_v4 = vmul.f32 %v446_v45, %v435_v53  ;;  %v449_v18 = vmul.f32 %v442_v52, %v434_v63  ;;  %v1622_v53 = vld [vmem:[%s1873_s2] sm:$0xf] }
 0x182   : > { %v354_v35 = vrot.slane %v349_v24, %v1537_v28 }
 0x183   : > { %v525_v56 = vpack.c.bf16 %v515_v48, %v515_v48  ;;  %v526_v57 = vpack.c.bf16 %v516_v49, %v516_v49  ;;  %v386_v58 = vpop.permute.xlu1 %385  ;;  %v388_v59 = vpop.permute.xlu0 %387  ;;  %v522_v23 = vpack.c.bf16 %v450_v4, %v1496_v17  ;;  %v521_v33 = vpack.c.bf16 %v449_v18, %v1489_v13 }
 0x184   : > { %v390_v19 = vsel %vm389_vm6, %v386_v58, %v388_v59  ;;  %v391_v30 = vsel %vm389_vm6, %v388_v59, %v386_v58 }
 0x185   : > { %1107 = vmatprep.subr.msk.bf16.mxu1 %vm536_vm5, %v526_v57  ;;  %v538_v6 = vsel %vm536_vm5, %v525_v56, 0  ;;  %v406_v31 = vmul.f32 %v402_v11, %v390_v19  ;;  %v405_v40 = vmul.f32 %v398_v26, %v391_v30  ;;  %v1640_v11 = vld [vmem:[%s1449_s13 + $0x20] sm:$0xff] }
 0x186   : > { %550 = vmatpush1.bf16.msra.mxu1 %v538_v6 }
 0x187   : > { %v408_v12 = vpop.permute.xlu1 %407  ;;  %551 = vmatprep.subr.bf16.mxu1 %v524_v7  ;;  %v410_v15 = vpop.permute.xlu0 %409 }
 0x188   : > { %v412_v20 = vsel %vm411_vm7, %v408_v12, %v410_v15  ;;  %v413_v21 = vsel %vm411_vm7, %v410_v15, %v408_v12  ;;  %v1643_v12 = vld [vmem:[%s1449_s13 + $0x30] sm:$0xff]  ;;  %v1650_v15 = vld [vmem:[%s1874_s3] sm:$0xff]  }
 0x189   : > { %v428_v22 = vmul.f32 %v424_v62, %v412_v20  ;;  %v427_v34 = vmul.f32 %v420_v14, %v413_v21  ;;  %v1635_v62 = vld [vmem:[%s1449_s13 + $0x38] sm:$0xff]  ;;  %s1889_s13 = smov 17  }
 0x18a   : > { %552 = vmatpush1.bf16.msra.mxu1 %v523_v16  ;;  %v674_v10 = vpack.c.bf16 %v1635_v62, %v1632_v61  ;;  %v673_v16 = vpack.c.bf16 %v1643_v12, %v1640_v11 }
 0x18b   : > { %v341_v32 = vpop.permute.xlu1 %340  ;;  %553 = vmatprep.subr.bf16.mxu1 %v522_v23  ;;  %v343_v17 = vpop.permute.xlu0 %342  ;;  %v520_v37 = vpack.c.bf16 %v428_v22, %v406_v31  ;;  %v519_v44 = vpack.c.bf16 %v427_v34, %v405_v40  ;;  %v277_v31 = vld [vmem:[%s1875_s4 + $0x18] sm:$0xff] }
 0x18c   : > { %v347_v41 = vsel %vm346_vm8, %v341_v32, %v343_v17  ;;  %v348_v42 = vsel %vm346_vm8, %v343_v17, %v341_v32  ;;  %v1123_v32 = vld [vmem:[%s1876_s5 + $0x10] ss:$8 sm:$0x3] }
 0x18d   : > { %v361_v47 = vmul.f32 %v354_v35, %v348_v42  ;;  %v362_v48 = vmul.f32 %v358_v36, %v347_v41  ;;  %v873_v34 = vrot.slane %v1123_v32, %v1539_v29  ;;  %v1121_v41 = vld [vmem:[%s1876_s5 + $0x6] ss:$8 sm:$0x3]  ;;  %v1122_v42 = vld [vmem:[%s1876_s5 + $0x7] ss:$8 sm:$0x3] }
 0x18e   : > { %554 = vmatpush1.bf16.msra.mxu1 %v521_v33  ;;  %v869_v33 = vrot.slane %v1123_v32, %v1537_v28 }
 0x18f   : > { %v364_v13 = vpop.permute.xlu1 %363  ;;  %555 = vmatprep.subr.bf16.mxu1 %v520_v37  ;;  %v366_v43 = vpop.permute.xlu0 %365 }
 0x190   : > { %v368_v45 = vsel %vm367_vm9, %v364_v13, %v366_v43  ;;  %v369_v46 = vsel %vm367_vm9, %v366_v43, %v364_v13 }
 0x191   : > { %v383_v49 = vmul.f32 %v376_v38, %v369_v46  ;;  %v384_v50 = vmul.f32 %v380_v39, %v368_v45  ;;  %v829_v45 = vrot.slane %v1121_v41, %v1537_v28  ;;  %v833_v46 = vrot.slane %v1121_v41, %v1539_v29 }
 0x192   : > { %556 = vmatpush1.bf16.msra.mxu1 %v519_v44 }
 0x193   : > { %v517_v51 = vpack.c.bf16 %v383_v49, %v361_v47  ;;  %v518_v52 = vpack.c.bf16 %v384_v50, %v362_v48  ;;  %v849_v49 = vrot.slane %v1122_v42, %v1537_v28  ;;  %v853_v50 = vrot.slane %v1122_v42, %v1539_v29 }
 0x195   : > { %557 = vmatprep.subr.bf16.mxu1 %v518_v52 }
 0x196   : > { %558 = vmatpush1.bf16.msra.mxu1 %v517_v51  ;;  %v1120_v51 = vld [vmem:[%s1876_s5 + $0x5] ss:$8 sm:$0x3] }
 0x199   : > { %1108 = vmatmul.mubr.msk.bf16.vlgmr.msra.gmra.mxu1 %vm532_vm10, %v1622_v53 }
 0x19a   : > { %977 = vmatprep.mubr.bf16.mxu1 %v1300_v0 }
 0x19c   : > { %v1627_v54 = vpop.permute.xlu1 %529 }
 0x259   : > { %v577_v55 = vpop.f32.mrf.mxu1 }
 0x25a   : > { %v578_v56 = vadd.f32 %v577_v55, %v1627_v54 }
 0x25b   : > { %v579_v57 = vpop.f32.mrf.mxu1 }
 0x25c   : > { %v584_v58 = vmax.f32 %v578_v56, 0.0  ;;  %v580_v59 = vadd.f32 %v579_v57, %v1627_v54 }
 0x25d   : > { %v581_v60 = vpop.f32.mrf.mxu1 }
 0x25e   : > { %v586_v63 = vpack.c.bf16 %v584_v58, %v584_v58  ;;  %v585_v4 = vmax.f32 %v580_v59, 0.0  ;;  %v809_v59 = vrot.slane %v1120_v51, %v1537_v28  ;;  %v813_v60 = vrot.slane %v1120_v51, %v1539_v29 }
 0x25f   : > { %v582_v6 = vpop.f32.mrf.mxu1 }
 0x260   : > { %v587_v7 = vpack.c.bf16 %v585_v4, %v585_v4  ;;  %v608_v14 = vsel %vm536_vm5, %v586_v63, 0 }
 0x262   : > { %1110 = vmatprep.subr.msk.bf16.mxu0 %vm536_vm5, %v587_v7 }
 0x263   : > { %628 = vmatpush1.bf16.msra.mxu0 %v608_v14 }
 0x264   : > { %689 = vmatprep.subr.bf16.mxu0 %v674_v10 }
 0x266   : > { %1111 = vmatmul.mubr.msk.bf16.vlgmr.msra.gmra.mxu0 %vm603_vm11, %v1650_v15 }
 0x267   : > { %690 = vmatpush1.bf16.msra.mxu0 %v673_v16  ;;  %707 = vmatprep.mubr.bf16.mxu0 %v1300_v0 }
 0x26e   : > { %1116 = vmatmul.mubr.msk.bf16.vlgmr.msra.gmra.mxu0 %vm293_vm0, %v1481_v8 }
 0x26f   : > { %926 = vmatprep.mubr.bf16.mxu0 %v1300_v0 }
 0x326   : > { %v1660_v18 = vpop.f32.mrf.mxu0 }
 0x328   : > { %v1662_v19 = vpop.f32.mrf.mxu0 }
 0x32a   : > { %v1664_v20 = vpop.f32.mrf.mxu0 }
 0x32c   : > { %v1666_v21 = vpop.f32.mrf.mxu0 }
 0x32e   : > { %v709_v22 = vpop.f32.mrf.mxu0 }
 0x32f   : > { %v710_v23 = vadd.f32 %v709_v22, %v1486_v9 }
 0x330   : > { %v711_v24 = vpop.f32.mrf.mxu0 }
 0x331   : > { %v1669_v26 = vmax.f32 %v710_v23, 0.0  ;;  %v712_v27 = vadd.f32 %v711_v24, %v1486_v9  ;;  %v276_v9 = vld [vmem:[%s1875_s4 + $0x10] sm:$0xff] }
 0x332   : > { %v713_v30 = vpop.f32.mrf.mxu0 }
 0x333   : > { %v1672_v8 = vmax.f32 %v712_v27, 0.0  ;;  %858 = vrot.lane.b32.xlu0 %v1669_v26, %s1302_s11 }
 0x334   : > { %v714_v0 = vpop.f32.mrf.mxu0 }
 0x335   : > { %860 = vrot.lane.b32.xlu1 %v1672_v8, %s1302_s11  ;;  %s1002_s11 = scalar_lea.sflag [#allocation4], %s1443_s29 }
 0x337   : > { %818 = vrot.lane.b32.xlu0 %v1669_v26, %s1301_s20 }
 0x339   : > { %820 = vrot.lane.b32.xlu1 %v1672_v8, %s1301_s20  ;;  %s1823_s20 = scalar_lea.hbm %s1877_s6, %s1141_s16 }
 0x33b   : > { %838 = vrot.lane.b32.xlu0 %v1669_v26, %s1303_s14 }
 0x33d   : > { %840 = vrot.lane.b32.xlu1 %v1672_v8, %s1303_s14  ;;  %s1309_s14 = smov [#allocation5]  }
 0x33f   : > { %798 = vrot.lane.b32.xlu0 %v1669_v26, %s1304_s15 }
 0x341   : > { %800 = vrot.lane.b32.xlu1 %v1672_v8, %s1304_s15  ;;  %s1235_s15 = sshll.u32 %s1309_s14, 4  ;;  %s1236_s15 = int_to_ptr.vmem [resolvable:$false] %s1235_s15 }
 0x342   : > { %p1238_p5 = scmp.lt.s32.totalorder %s1826_s12, %s1236_s15 }
 0x343   : > { %758 = vrot.lane.b32.xlu0 %v1669_v26, %s1305_s17 }
 0x345   : > { %760 = vrot.lane.b32.xlu1 %v1672_v8, %s1305_s17  ;;  %s1237_s17 = scalar_lea.vmem %s1236_s15, 2048 }
 0x346   : > { %p1239_p7 = scmp.lt.s32.totalorder %s1237_s17, %s1231_s25 }
 0x347   : > { %778 = vrot.lane.b32.xlu0 %v1669_v26, %s1306_s26 }
 0x348   : > { %p1240_p8 = por %p1239_p7, %p1238_p5 }
 0x349   : > { %780 = vrot.lane.b32.xlu1 %v1672_v8, %s1306_s26 }
 0x34a   : > { %p1241_p10 = pnand %p1240_p8, %p1234_p4 }
 0x34b   : > { %718 = vrot.lane.b32.xlu0 %v1669_v26, %s1889_s13 }
 0x34d   : > { %720 = vrot.lane.b32.xlu1 %v1672_v8, %s1889_s13 }
 0x34f   : > { %738 = vrot.lane.b32.xlu0 %v1669_v26, %s1308_s7 }
 0x351   : > { %740 = vrot.lane.b32.xlu1 %v1672_v8, %s1308_s7 }
 0x353   : > { %590 = vperm.xlu0 %1200, %v276_v9   ;;  %v1118_v9 = vld [vmem:[%s1876_s5 + $0x2] ss:$8 sm:$0x3] }
 0x355   : > { %595 = vperm.xlu1 %1201, %v277_v31   ;;  %v1119_v31 = vld [vmem:[%s1876_s5 + $0x3] ss:$8 sm:$0x3] }
 0x3a5   : > { %v859_v17 = vpop.permute.xlu0 %858 }
 0x3a7   : > { %v861_v35 = vpop.permute.xlu1 %860 }
 0x3a8   : > { %v862_v36 = vsel %vm499_vm3, %v859_v17, %v861_v35  ;;  %v863_v37 = vsel %vm499_vm3, %v861_v35, %v859_v17  ;;  %v773_v35 = vrot.slane %v1118_v9, %v1539_v29 }
 0x3a9   : > { %v876_v38 = vmul.f32 %v869_v33, %v862_v36  ;;  %v877_v39 = vmul.f32 %v873_v34, %v863_v37  ;;  %v819_v40 = vpop.permute.xlu0 %818  ;;  %v769_v34 = vrot.slane %v1118_v9, %v1537_v28  ;;  %v789_v37 = vrot.slane %v1119_v31, %v1537_v28 }
 0x3ab   : > { %v886_v13 = vpack.c.bf16 %v876_v38, %v876_v38  ;;  %v887_v43 = vpack.c.bf16 %v877_v39, %v877_v39  ;;  %v821_v44 = vpop.permute.xlu1 %820  ;;  %v793_v38 = vrot.slane %v1119_v31, %v1539_v29 }
 0x3ac   : > { %v822_v52 = vsel %vm455_vm2, %v819_v40, %v821_v44  ;;  %v823_v55 = vsel %vm455_vm2, %v821_v44, %v819_v40 }
 0x3ad   : > { %1124 = vmatprep.subr.msk.bf16.mxu0 %vm536_vm5, %v887_v43  ;;  %v839_v47 = vpop.permute.xlu0 %838  ;;  %v889_v48 = vsel %vm536_vm5, %v886_v13, 0  ;;  %v836_v63 = vmul.f32 %v829_v45, %v822_v52  ;;  %v837_v4 = vmul.f32 %v833_v46, %v823_v55  ;;  %v724_v46 = vld [vmem:[%s1876_s5] ss:$8 sm:$0x3] }
 0x3ae   : > { %901 = vmatpush1.bf16.msra.mxu0 %v889_v48  ;;  %v729_v51 = vrot.slane %v724_v46, %v1537_v28  ;;  %v733_v52 = vrot.slane %v724_v46, %v1539_v29 }
 0x3af   : > { %v841_v56 = vpop.permute.xlu1 %840 }
 0x3b0   : > { %v842_v57 = vsel %vm477_vm1, %v839_v47, %v841_v56  ;;  %v843_v58 = vsel %vm477_vm1, %v841_v56, %v839_v47  ;;  %v1117_v47 = vld [vmem:[%s1876_s5 + $0x1] ss:$8 sm:$0x3] }
 0x3b1   : > { %v856_v6 = vmul.f32 %v849_v49, %v842_v57  ;;  %v857_v7 = vmul.f32 %v853_v50, %v843_v58  ;;  %v799_v10 = vpop.permute.xlu0 %798  ;;  %v749_v55 = vrot.slane %v1117_v47, %v1537_v28  ;;  %v753_v56 = vrot.slane %v1117_v47, %v1539_v29 }
 0x3b3   : > { %v884_v14 = vpack.c.bf16 %v856_v6, %v836_v63  ;;  %v801_v16 = vpop.permute.xlu1 %800  ;;  %v885_v22 = vpack.c.bf16 %v857_v7, %v837_v4 }
 0x3b4   : > { %v802_v23 = vsel %vm433_vm4, %v799_v10, %v801_v16  ;;  %v803_v24 = vsel %vm433_vm4, %v801_v16, %v799_v10 }
 0x3b5   : > { %v816_v27 = vmul.f32 %v809_v59, %v802_v23  ;;  %v817_v30 = vmul.f32 %v813_v60, %v803_v24  ;;  %902 = vmatprep.subr.bf16.mxu0 %v885_v22  ;;  %v759_v0 = vpop.permute.xlu0 %758 }
 0x3b6   : > { %903 = vmatpush1.bf16.msra.mxu0 %v884_v14 }
 0x3b7   : > { %v882_v32 = vpack.c.bf16 %v816_v27, %v1669_v26  ;;  %v761_v17 = vpop.permute.xlu1 %760  ;;  %v883_v33 = vpack.c.bf16 %v817_v30, %v1672_v8 }
 0x3b8   : > { %v762_v39 = vsel %vm389_vm6, %v759_v0, %v761_v17  ;;  %v763_v40 = vsel %vm389_vm6, %v761_v17, %v759_v0 }
 0x3b9   : > { %904 = vmatprep.subr.bf16.mxu0 %v883_v33  ;;  %v779_v36 = vpop.permute.xlu0 %778  ;;  %v776_v42 = vmul.f32 %v769_v34, %v763_v40  ;;  %v777_v13 = vmul.f32 %v773_v35, %v762_v39 }
 0x3ba   : > { %905 = vmatpush1.bf16.msra.mxu0 %v882_v32 }
 0x3bb   : > { %v781_v26 = vpop.permute.xlu1 %780 }
 0x3bc   : > { %v782_v8 = vsel %vm411_vm7, %v779_v36, %v781_v26  ;;  %v783_v41 = vsel %vm411_vm7, %v781_v26, %v779_v36 }
 0x3bd   : > { %v796_v43 = vmul.f32 %v789_v37, %v783_v41  ;;  %v797_v44 = vmul.f32 %v793_v38, %v782_v8  ;;  %v719_v45 = vpop.permute.xlu0 %718 }
 0x3bf   : > { %v880_v48 = vpack.c.bf16 %v796_v43, %v776_v42  ;;  %v721_v49 = vpop.permute.xlu1 %720  ;;  %v881_v50 = vpack.c.bf16 %v797_v44, %v777_v13 }
 0x3c0   : > { %v722_v57 = vsel %vm346_vm8, %v719_v45, %v721_v49  ;;  %v723_v58 = vsel %vm346_vm8, %v721_v49, %v719_v45 }
 0x3c1   : > { %906 = vmatprep.subr.bf16.mxu0 %v881_v50  ;;  %v739_v59 = vpop.permute.xlu0 %738  ;;  %v736_v6 = vmul.f32 %v729_v51, %v723_v58  ;;  %v737_v7 = vmul.f32 %v733_v52, %v722_v57 }
 0x3c2   : > { %907 = vmatpush1.bf16.msra.mxu0 %v880_v48 }
 0x3c3   : > { %v741_v60 = vpop.permute.xlu1 %740 }
 0x3c4   : > { %v742_v63 = vsel %vm367_vm9, %v739_v59, %v741_v60  ;;  %v743_v4 = vsel %vm367_vm9, %v741_v60, %v739_v59 }
 0x3c5   : > { %v756_v28 = vmul.f32 %v749_v55, %v743_v4  ;;  %v757_v10 = vmul.f32 %v753_v56, %v742_v63 }
 0x3c7   : > { %v878_v29 = vpack.c.bf16 %v756_v28, %v736_v6  ;;  %v879_v14 = vpack.c.bf16 %v757_v10, %v737_v7 }
 0x3c9   : > { %908 = vmatprep.subr.bf16.mxu0 %v879_v14 }
 0x3ca   : > { %909 = vmatpush1.bf16.msra.mxu0 %v878_v29 }
 0x3cd   : > { %1125 = vmatmul.mubr.msk.bf16.vlgmr.msra.gmra.mxu0 %vm532_vm10, %v1622_v53 }
 0x3ce   : > { %v591_v16 = vpop.permute.xlu0 %590 }
 0x3cf   : > { %v648_v22 = vadd.f32 %v1660_v18, %v591_v16  ;;  %v650_v23 = vadd.f32 %v1662_v19, %v591_v16 }
 0x3d0   : > { %v596_v24 = vpop.permute.xlu1 %595 }
 0x3d1   : > { %v656_v25 = vadd.f32 %v648_v22, %v1466_v3  ;;  %v657_v27 = vadd.f32 %v650_v23, %v1460_v1  ;;  %v652_v30 = vadd.f32 %v1664_v20, %v596_v24  ;;  %v654_v0 = vadd.f32 %v1666_v21, %v596_v24 }
 0x3d3   : > { %v660_v9 = vmax.f32 %v656_v25, 0.0  ;;  %v661_v31 = vmax.f32 %v657_v27, 0.0  ;;  %v658_v32 = vadd.f32 %v652_v30, %v1471_v5  ;;  %v659_v53 = vadd.f32 %v654_v0, %v1463_v2 }
 0x3d5   : > { %664 = vst [vmem:[%s1800_s8] sm:$0xff] %v660_v9  ;;  %665 = vst [vmem:[%s1800_s8 + $0x8] sm:$0xff] %v661_v31  ;;  %v662_v1 = vmax.f32 %v658_v32, 0.0  ;;  %v663_v3 = vmax.f32 %v659_v53, 0.0 }
 0x3d7   : > { %666 = vst [vmem:[%s1800_s8 + $0x10] sm:$0xff] %v662_v1  ;;  %667 = vst [vmem:[%s1800_s8 + $0x18] sm:$0xff] %v663_v3 }
 0x48d   : > { %v928_v18 = vpop.f32.mrf.mxu0 }
 0x48e   : > { %v929_v19 = vadd.f32 %v928_v18, %v1627_v54 }
 0x48f   : > { %v930_v20 = vpop.f32.mrf.mxu0 }
 0x490   : > { %v935_v5 = vmax.f32 %v929_v19, 0.0  ;;  %v931_v2 = vadd.f32 %v930_v20, %v1627_v54 }
 0x491   : > { %v932_v21 = vpop.f32.mrf.mxu0 }
 0x492   : > { %v937_v17 = vpack.c.bf16 %v935_v5, %v935_v5  ;;  %v936_v33 = vmax.f32 %v931_v2, 0.0 }
 0x493   : > { %v933_v34 = vpop.f32.mrf.mxu0 }
 0x494   : > { %v938_v35 = vpack.c.bf16 %v936_v33, %v936_v33  ;;  %v940_v36 = vsel %vm536_vm5, %v937_v17, 0 }
 0x496   : > { %1126 = vmatprep.subr.msk.bf16.mxu1 %vm536_vm5, %v938_v35 }
 0x497   : > { %960 = vmatpush1.bf16.msra.mxu1 %v940_v36 }
 0x49a   : > { %1127 = vmatmul.mubr.msk.bf16.vlgmr.msra.gmra.mxu1 %vm603_vm11, %v1650_v15 }
 0x55a   : > { %v979_v37 = vpop.f32.mrf.mxu1 }
 0x55b   : > { %v980_v38 = vadd.f32 %v979_v37, %v591_v16 }
 0x55c   : > { %v981_v54 = vpop.f32.mrf.mxu1 }
 0x55d   : > { %v988_v39 = vadd.f32 %v1640_v11, %v980_v38  ;;  %v982_v40 = vadd.f32 %v981_v54, %v591_v16 }
 0x55e   : > { %v983_v26 = vpop.f32.mrf.mxu1 }
 0x55f   : > { %v992_v8 = vmax.f32 %v988_v39, 0.0  ;;  %v989_v41 = vadd.f32 %v1632_v61, %v982_v40  ;;  %v984_v42 = vadd.f32 %v983_v26, %v596_v24 }
 0x560   : > { %v985_v13 = vpop.f32.mrf.mxu1 }
 0x561   : > { %1128 = vst [vmem:[%s1800_s8 + $0x20] sm:$0xff] %v992_v8  ;;  %v993_v43 = vmax.f32 %v989_v41, 0.0  ;;  %v990_v15 = vadd.f32 %v1643_v12, %v984_v42  ;;  %v986_v44 = vadd.f32 %v985_v13, %v596_v24 }
 0x563   : > { %1129 = vst [vmem:[%s1800_s8 + $0x28] sm:$0xff] %v993_v43  ;;  %v994_v11 = vmax.f32 %v990_v15, 0.0  ;;  %v991_v45 = vadd.f32 %v1635_v62, %v986_v44 }
 0x565   : > { %1130 = vst [vmem:[%s1800_s8 + $0x30] sm:$0xff] %v994_v11  ;;  %v995_v61 = vmax.f32 %v991_v45, 0.0 }
 0x567   : > { %1131 = vst [vmem:[%s1800_s8 + $0x38] sm:$0xff] %v995_v61 }
 0x568   : > { %1244 = shalt.err (!%p1241_p10)
}
 0x569   : > { %s1245_s26 = scalar_lea.hbm %s1823_s20, 1024  ;;  %s1249_s8 = scalar_lea.hbm %s1877_s6, 2048 }
 0x56a   : > { %p1246_p0 = scmp.ne.s32.totalorder %s1823_s20, %s1245_s26  ;;  %p1250_p1 = scmp.lt.s32.totalorder %s1823_s20, %s1877_s6 }
 0x56b   : > { %p1251_p3 = scmp.lt.s32.totalorder %s1249_s8, %s1245_s26 }
 0x56c   : > { %p1247_p2 = pnand %p1246_p0, %p1891_p12 }
 0x56d   : > { %p1252_p6 = por %p1251_p3, %p1250_p1 }
 0x56e   : > { %p1248_p9 = pneg %p1247_p2 }
 0x570   : > { %p1253_p11 = pnand %p1252_p6, %p1248_p9 }
 0x572   : > { %1256 = shalt.err (!%p1253_p11)
}
 0x573   : > { %s1310_s13 = smov 256  }
 0x574   : > { %1144 = dma.vmem_to_hbm [thread:$0]  (%p1891_p12), %s1826_s12, 1024, %s1823_s20, %s1002_s11, %s1310_s13, %s1310_s13, %s1308_s7  }
 0x575 PF: > { %s1031_s25 = sand.u32 1, %s1283_s21   ;;  %p1892_p13 = scmp.ne.s32.totalorder %s1886_s10, 0 }
 0x576   : > { %p1893_p4 = scmp.ge.s32.totalorder %s1295_s24, 2  ;;  %s1032_s14 = scalar_lea.sflag [#allocation4], %s1031_s25 }
 0x578   : > { %p1151_p5 = pnand %p1893_p4, %p1892_p13 }
 0x57a   : > { %p1152_p7 = pneg %p1151_p5 }
 0x57c   : > { %1278 = dma.done.wait (%p1152_p7), %s1032_s14, 1024  }
 0x57d   : > { %1280 = vsyncadd (%p1152_p7), %s1032_s14, 4294966272  ;;  %p19_p8 = scmp.ge.s32.totalorder %s1371_s27, 4   ;;  %s1894_s21 = smov %s1287_s22 }
 0x57e   : > { %s1895_s22 = smov %s1291_s23  ;;  %s1896_s23 = smov %s1383_s30 }
 0x57f   : > { %s1897_s24 = smov %s1371_s27  ;;  %21 = sbr.rel (!%p19_p8) target bundleno = 5 (0x5), region = 98 }
 0x584   :  { %1037 = vsyncpa [#allocation3], 1 }
 0x585   :  { %1039 = vsyncpa [#allocation3 + $0x1], 1 }
 0x586   :  { %1040 = vsyncpa [#allocation4], 1 }
 0x587   :  { %1042 = vsyncpa [#allocation4 + $0x1], 1 }

</bundles_post_ra>
